<compile_context>
chip_gen: v5e
topology: v5e:2x2
jax: 0.10.0
libtpu: 0.0.40
codegen_flags: <defaults>
</compile_context>

<pallas_src>
import jax
import jax.numpy as jnp
from jax.experimental import pallas as pl
from jax.experimental.pallas import tpu as pltpu

_TB_MAX = 65536  # lane-tile cap; intermediates ~13 MiB << 32 MiB scoped VMEM


def actor_kernel(x_ref, w_ref, o_ref):
    # x_ref: (1, TB)   batch on lanes
    # w_ref: (40, 16)  rows 0:16 = W2, rows 16:18 = W3 (rest of 16:24 zero),
    #                  rows 24:40: col0 = W1[:,0], col1 = b1, col2 = b2,
    #                  col3[0:2] = b3
    # o_ref: (2, TB)
    x = x_ref[...]                                    # (1, TB)
    w1 = w_ref[24:40, 0:1]                            # (16, 1)
    b1 = w_ref[24:40, 1:2]                            # (16, 1)
    b2 = w_ref[24:40, 2:3]                            # (16, 1)
    b3 = w_ref[24:26, 3:4]                            # (2, 1)

    # fc1: in_features = 1 -> K=1 matmul is MXU waste; VPU outer product.
    h1 = jnp.maximum(w1 * x + b1, 0.0)                # (16, TB)

    # fc2: (16,16) @ (16,TB) on the MXU, bias+ReLU fused into the epilogue.
    w2 = w_ref[0:16, :]                               # (16, 16)
    h2 = jnp.maximum(
        jnp.dot(w2, h1, preferred_element_type=jnp.float32) + b2, 0.0)

    # fc3: W3 zero-padded to 8 rows (sublane-aligned lhs); slice the 2 real
    # rows while consuming the MXU result, fuse bias + sigmoid + scale.
    w3 = w_ref[16:24, :]                              # (8, 16)
    z8 = jnp.dot(w3, h2, preferred_element_type=jnp.float32)   # (8, TB)
    z = z8[0:2, :] + b3                               # (2, TB)
    o_ref[...] = 100.0 * jax.nn.sigmoid(z)            # exp -> EUP slot


def pack_params(params):
    """Pack the 6 PyTorch-shaped tensors into one (40,16) constant slab."""
    w1, b1, w2, b2, w3, b3 = params
    slab = jnp.zeros((40, 16), jnp.float32)
    slab = slab.at[0:16, :].set(w2.astype(jnp.float32))
    slab = slab.at[16:18, :].set(w3.astype(jnp.float32))
    slab = slab.at[24:40, 0].set(w1[:, 0].astype(jnp.float32))
    slab = slab.at[24:40, 1].set(b1.astype(jnp.float32))
    slab = slab.at[24:40, 2].set(b2.astype(jnp.float32))
    slab = slab.at[24:26, 3].set(b3.astype(jnp.float32))
    return slab


def _round_up(x, m):
    return ((x + m - 1) // m) * m


def _choose_tb(B, tb):
    if tb is None:
        # Balance the batch over >=2 grid steps (v7x megacore) without
        # exceeding the VMEM-friendly lane-tile cap.
        n_steps = max(2, pl.cdiv(max(B, 1), _TB_MAX))
        tb = pl.cdiv(max(B, 1), n_steps)
    return min(_TB_MAX, max(128, _round_up(int(tb), 128)))


def actor_forward(state, params, *, tb=None, batch_major=True):
    """state: (B, 1) float32.

    Returns (B, 2) = 100*sigmoid(fc3(relu(fc2(relu(fc1(state)))))).
    With batch_major=False returns the channel-major (2, B) result so a
    consumer that can fuse the layout skips the trailing transpose pass.
    """
    B = state.shape[0]
    tb = _choose_tb(B, tb)
    grid_n = pl.cdiv(B, tb)
    Bp = grid_n * tb

    # (B,1) -> (1,B) is a free layout-preserving reshape; pad only the remainder.
    xt = state.astype(jnp.float32).reshape(1, B)
    if Bp != B:
        xt = jnp.pad(xt, ((0, 0), (0, Bp - B)))

    slab = pack_params(params)

    cost = pl.CostEstimate(
        flops=2 * Bp * (16 + 16 * 16 + 16 * 2),
        transcendentals=2 * Bp,
        bytes_accessed=12 * Bp + slab.size * 4,
    )

    out_t = pl.pallas_call(
        actor_kernel,
        out_shape=jax.ShapeDtypeStruct((2, Bp), jnp.float32),
        grid_spec=pltpu.PrefetchScalarGridSpec(
            num_scalar_prefetch=0,
            grid=(grid_n,),
            in_specs=[
                pl.BlockSpec((1, tb), lambda i: (0, i)),     # x tile (lane-dense)
                pl.BlockSpec((40, 16), lambda i: (0, 0)),    # resident weight slab
            ],
            out_specs=pl.BlockSpec((2, tb), lambda i: (0, i)),  # lane-dense stores
        ),
        compiler_params=pltpu.CompilerParams(
            dimension_semantics=("parallel",),               # shard steps over TCs
            vmem_limit_bytes=32 * 1024 * 1024,               # covers v5e's 16MiB default
        ),
        cost_estimate=cost,
    )(xt, slab)

    if Bp != B:
        out_t = out_t[:, :B]
    if not batch_major:
        return out_t                                         # (2, B), fuse in consumer
    return out_t.T                                           # (B, 2) module semantics


def init_params(key):
    """PyTorch nn.Linear-shaped params: W (out,in), b (out,)."""
    ks = jax.random.split(key, 6)
    w1 = jax.random.uniform(ks[0], (16, 1), jnp.float32, -1.0, 1.0)     # fc1
    b1 = jax.random.uniform(ks[1], (16,), jnp.float32, -1.0, 1.0)
    w2 = jax.random.uniform(ks[2], (16, 16), jnp.float32, -0.25, 0.25)  # fc2
    b2 = jax.random.uniform(ks[3], (16,), jnp.float32, -0.25, 0.25)
    w3 = jax.random.uniform(ks[4], (2, 16), jnp.float32, -0.25, 0.25)   # fc3
    b3 = jax.random.uniform(ks[5], (2,), jnp.float32, -0.25, 0.25)
    return (w1, b1, w2, b2, w3, b3)


def actor_ref(state, params):
    w1, b1, w2, b2, w3, b3 = params
    h1 = jnp.maximum(state @ w1.T + b1, 0.0)
    h2 = jnp.maximum(h1 @ w2.T + b2, 0.0)
    z = h2 @ w3.T + b3
    return 100.0 * jax.nn.sigmoid(z)


if __name__ == "__main__":
    key = jax.random.PRNGKey(0)
    pkey, xkey = jax.random.split(key)
    params = init_params(pkey)

    # Small batch of scalar states, shape (B, 1) like PyTorch Linear(1, ...).
    B = 256                                   # -> tb=128, grid of 2 steps
    state = jax.random.normal(xkey, (B, 1), jnp.float32)

    out = jax.block_until_ready(actor_forward(state, params))
    ref = actor_ref(state, params)
    assert out.shape == (B, 2)
    assert jnp.allclose(out, ref, atol=1e-4, rtol=1e-4), "mismatch vs JAX reference"

    # Ragged batch exercising the remainder-pad / slice path.
    small = jax.random.normal(xkey, (7, 1), jnp.float32)
    out_s = jax.block_until_ready(actor_forward(small, params))
    assert jnp.allclose(out_s, actor_ref(small, params), atol=1e-4, rtol=1e-4)

    # Channel-major variant (consumer fuses the transpose away).
    out_cm = jax.block_until_ready(actor_forward(state, params, batch_major=False))
    assert out_cm.shape == (2, B)
    assert jnp.allclose(out_cm.T, ref, atol=1e-4, rtol=1e-4)

    print("KERNEL_OK")
</pallas_src>

<mosaic_0001>
module attributes {stable_mosaic.version = 11 : i64} {
  func.func @actor_kernel(%arg0: i32, %arg1: memref<1x128xf32, #tpu.memory_space<vmem>>, %arg2: memref<40x16xf32, #tpu.memory_space<vmem>>, %arg3: memref<2x128xf32, #tpu.memory_space<vmem>>) attributes {dimension_semantics = [#tpu.dimension_semantics<parallel>], iteration_bounds = array<i64: 2>, scalar_prefetch = 0 : i64, scratch_operands = 0 : i64, tpu.core_type = #tpu.core_type<tc>, window_params = [{transform_indices = @transform_0, window_bounds = array<i64: 1, 128>}, {pipeline_mode = #tpu.pipeline_mode<synchronous>, transform_indices = @transform_1, window_bounds = array<i64: 40, 16>}, {transform_indices = @transform_2, window_bounds = array<i64: 2, 128>}]} {
    %c0 = arith.constant 0 : index
    %c0_0 = arith.constant 0 : index
    %0 = vector.load %arg1[%c0, %c0_0] : memref<1x128xf32, #tpu.memory_space<vmem>>, vector<1x128xf32>
    %c24 = arith.constant 24 : index
    %c0_1 = arith.constant 0 : index
    %1 = vector.load %arg2[%c24, %c0_1] : memref<40x16xf32, #tpu.memory_space<vmem>>, vector<16x1xf32>
    %c24_2 = arith.constant 24 : index
    %c1 = arith.constant 1 : index
    %2 = vector.load %arg2[%c24_2, %c1] : memref<40x16xf32, #tpu.memory_space<vmem>>, vector<16x1xf32>
    %c24_3 = arith.constant 24 : index
    %c2 = arith.constant 2 : index
    %3 = vector.load %arg2[%c24_3, %c2] : memref<40x16xf32, #tpu.memory_space<vmem>>, vector<16x1xf32>
    %c24_4 = arith.constant 24 : index
    %c3 = arith.constant 3 : index
    %4 = vector.load %arg2[%c24_4, %c3] : memref<40x16xf32, #tpu.memory_space<vmem>>, vector<2x1xf32>
    %5 = vector.broadcast %1 : vector<16x1xf32> to vector<16x128xf32>
    %6 = vector.broadcast %0 : vector<1x128xf32> to vector<16x128xf32>
    %7 = arith.mulf %5, %6 : vector<16x128xf32>
    %8 = vector.broadcast %2 : vector<16x1xf32> to vector<16x128xf32>
    %9 = arith.addf %7, %8 : vector<16x128xf32>
    %cst = arith.constant 0.000000e+00 : f32
    %10 = vector.broadcast %cst : f32 to vector<16x128xf32>
    %11 = arith.maximumf %9, %10 : vector<16x128xf32>
    %c0_5 = arith.constant 0 : index
    %c0_6 = arith.constant 0 : index
    %12 = vector.load %arg2[%c0_5, %c0_6] : memref<40x16xf32, #tpu.memory_space<vmem>>, vector<16x16xf32>
    %cst_7 = arith.constant dense<0.000000e+00> : vector<16x128xf32>
    %13 = tpu.matmul %12, %11, %cst_7 {dimension_numbers = #tpu.dot_dimension_numbers<[1], [0], [0], [1], [0, 0, 1, 1], [], []>} : vector<16x16xf32>, vector<16x128xf32>, vector<16x128xf32> -> vector<16x128xf32>
    %14 = vector.broadcast %3 : vector<16x1xf32> to vector<16x128xf32>
    %15 = arith.addf %13, %14 : vector<16x128xf32>
    %cst_8 = arith.constant 0.000000e+00 : f32
    %16 = vector.broadcast %cst_8 : f32 to vector<16x128xf32>
    %17 = arith.maximumf %15, %16 : vector<16x128xf32>
    %c16 = arith.constant 16 : index
    %c0_9 = arith.constant 0 : index
    %18 = vector.load %arg2[%c16, %c0_9] : memref<40x16xf32, #tpu.memory_space<vmem>>, vector<8x16xf32>
    %cst_10 = arith.constant dense<0.000000e+00> : vector<8x128xf32>
    %19 = tpu.matmul %18, %17, %cst_10 {dimension_numbers = #tpu.dot_dimension_numbers<[1], [0], [0], [1], [0, 0, 1, 1], [], []>} : vector<8x16xf32>, vector<16x128xf32>, vector<8x128xf32> -> vector<8x128xf32>
    %20 = vector.extract_strided_slice %19 {offsets = [0, 0], sizes = [2, 128], strides = [1, 1]} : vector<8x128xf32> to vector<2x128xf32>
    %21 = vector.broadcast %4 : vector<2x1xf32> to vector<2x128xf32>
    %22 = arith.addf %20, %21 : vector<2x128xf32>
    %23 = arith.negf %22 : vector<2x128xf32>
    %24 = math.exp %23 : vector<2x128xf32>
    %cst_11 = arith.constant 1.000000e+00 : f32
    %25 = vector.broadcast %cst_11 : f32 to vector<2x128xf32>
    %26 = arith.addf %25, %24 : vector<2x128xf32>
    %27 = arith.divf %25, %26 : vector<2x128xf32>
    %cst_12 = arith.constant 1.000000e+02 : f32
    %28 = vector.broadcast %cst_12 : f32 to vector<2x128xf32>
    %29 = arith.mulf %28, %27 : vector<2x128xf32>
    %c0_13 = arith.constant 0 : index
    %c0_14 = arith.constant 0 : index
    %30 = vector.load %arg3[%c0_13, %c0_14] : memref<2x128xf32, #tpu.memory_space<vmem>>, vector<2x128xf32>
    tpu.vector_store %arg3[%c0_13, %c0_14], %29 {strides = array<i32>} : memref<2x128xf32, #tpu.memory_space<vmem>>, vector<2x128xf32>,
    return
  }
  func.func @transform_0(%arg0: i32) -> (i32, i32) {
    %c0_i32 = arith.constant 0 : i32
    %c0_i32_0 = arith.constant 0 : i32
    return %c0_i32, %arg0 : i32, i32
  }
  func.func @transform_1(%arg0: i32) -> (i32, i32) {
    %c0_i32 = arith.constant 0 : i32
    %c0_i32_0 = arith.constant 0 : i32
    %c0_i32_1 = arith.constant 0 : i32
    return %c0_i32, %c0_i32_0 : i32, i32
  }
  func.func @transform_2(%arg0: i32) -> (i32, i32) {
    %c0_i32 = arith.constant 0 : i32
    %c0_i32_0 = arith.constant 0 : i32
    return %c0_i32, %arg0 : i32, i32
  }
}

</mosaic_0001>

<bundles_post_ra>
// kernel: tpu_custom_call.1
= control target key start
LH: loop header
LB: loop body
LE: loop exit
PB: predicated region body
PF: predicated region fallthrough
CT: control target
= control target key end

     0   :  { %7 = vsyncpa [#allocation3], 0  ;;  %s588_s0 = inlined_call_operand.vmem [shape: f32[1,256], index: 0, kind: input, shape index: {}]   ;;  %s589_s1 = inlined_call_operand.vmem [shape: f32[40,16], index: 1, kind: input, shape index: {}]   ;;  %s590_s2 = inlined_call_operand.hbm [shape: f32[2,256], index: 2, kind: output, shape index: {}]  }
   0x1   :  { %9 = vsyncpa [#allocation3 + $0x1], 0  ;;  %s482_s9 = smov 0   ;;  %s484_s10 = smov 0  }
   0x2   :  { %s486_s11 = smov 0   ;;  %s488_s12 = smov 0  }
   0x3 LB: > { %s503_s13 = sadd.s32 4294967295, %s461_s12   ;;  %s332_s14 = sadd.s32 4294967294, %s461_s12   ;;  %s461_s12 = sphi %s488_s12, %s596_s12   ;;  %s457_s11 = sphi %s486_s11, %s595_s11   ;;  %s453_s10 = sphi %s484_s10, %s594_s10   ;;  %s449_s9 = sphi %s482_s9, %s593_s9  }
   0x4   : > { %s507_s15 = sadd.s32 1, %s461_s12   ;;  %s69_s16 = sadd.s32 1, %s457_s11 }
   0x5   : > { %s66_s17 = ssub.s32 %s461_s12, %s507_s15  ;;  %p79_p0 = scmp.ne.s32.totalorder %s457_s11, %s453_s10 }
   0x6   : > { %p67_p1 = scmp.eq.s32.totalorder %s66_s17, 0  ;;  %p80_p2 = scmp.eq.s32.totalorder %s503_s13, 1 }
   0x7   : > { %p85_p3 = scmp.ne.s32.totalorder %s453_s10, %s449_s9  ;;  %p86_p4 = scmp.eq.s32.totalorder %s332_s14, 1 }
   0x8   : > { %s518_s18 = scalar_select %p67_p1, %s457_s11, %s69_s16  }
   0x9   : > { %p520_p5 = por %p80_p2, %p79_p0  ;;  %p524_p6 = por %p86_p4, %p85_p3 }
   0xa   : > { %p335_p7 = scmp.ge.s32.totalorder %s461_s12, 1  ;;  %p113_p8 = scmp.lt.s32.totalorder %s461_s12, 3 }
   0xc   : > { %p114_p9 = pnand %p335_p7, %p113_p8 }
   0xd   : > { %p133_p10 = scmp.lt.s32.totalorder (!%p114_p9), %s503_s13, 1  ;;  %s130_s14 = sand.u32 (!%p114_p9), 1, %s453_s10  }
   0xe   : > { %117 = sbr.rel (%p114_p9) target bundleno = 451 (0x1c3), region = 28  ;;  %s336_s16 = sshll.u32 (!%p114_p9), %s130_s14, 1 }
   0xf   : > { %s342_s17 = sshll.u32 (!%p114_p9), %s503_s13, 1  ;;  %s132_s24 = scalar_lea.vmem (!%p114_p9), [#allocation2], %s336_s16 }
  0x10   : > { %s273_s25 = sshll.u32 (!%p114_p9), %s132_s24, 4  ;;  %s419_s3 = scalar_lea.hbm (!%p114_p9), %s590_s2, 4  ;;  %s274_s25 = int_to_ptr.vmem [resolvable:$true] %s273_s25 }
  0x13   : > { %v138_v0 = vld [vmem:[%s589_s1 + $0x20] sm:$0xff]  ;;  %v463_v1 = vmov 1   ;;  %v464_v2 = vmov 0   ;;  %s134_s23 = scalar_select %p133_p10, %s503_s13, 1  ;;  %v137_v3 = vld [vmem:[%s589_s1 + $0x18] sm:$0xff]  ;;  %v465_v4 = vmov 2  }
  0x14   : > { %391 = vset.pattern.permute.xlu1 %v463_v1  ;;  %390 = vset.pattern.permute.xlu0 %v464_v2  ;;  %v167_v16 = vld [vmem:[%s589_s1] sm:$0xff]  ;;  %vm177_vm0 = vcmask 130048   ;;  %v168_v17 = vld [vmem:[%s589_s1 + $0x8] sm:$0xff]  ;;  %v139_v18 = vld [vmem:[%s589_s1 + $0x18] sm:$0x3]  ;;  %v466_v19 = vmov 3  }
  0x15   : > { %160 = vperm.xlu1 %391, %v138_v0   ;;  %147 = vperm.xlu0 %390, %v138_v0   ;;  %s135_s26 = scalar_lea.vmem %s588_s0, %s134_s23  ;;  %v209_v28 = vld [vmem:[%s589_s1 + $0x10] sm:$0xff]  ;;  %s271_s23 = scalar_lea.hbm %s590_s2, %s342_s17 }
  0x16   : > { %392 = vset.pattern.permute.xlu2 %v465_v4  ;;  %v394_v5 = vld [vmem:[%s135_s26] ss:$0 sm:$0xff]  ;;  %s275_s26 = sshll.u32 %s271_s23, 4  ;;  %s261_s13 = scalar_lea.sflag [#allocation3], %s130_s14  ;;  %s276_s26 = int_to_ptr.hbm [resolvable:$true] %s275_s26 }
  0x17   : > { %174 = vperm.xlu2 %392, %v138_v0   ;;  %s413_s27 = sshra.s32 %s276_s26, 4  ;;  %s414_s27 = int_to_ptr.hbm [resolvable:$true] %s413_s27 }
  0x18   : > { %s415_s28 = scalar_lea.hbm %s414_s27, 2  ;;  %p420_p0 = scmp.lt.s32.totalorder %s414_s27, %s590_s2 }
  0x19   : > { %p416_p11 = scmp.ne.s32.totalorder %s414_s27, %s415_s28  ;;  %p421_p1 = scmp.lt.s32.totalorder %s419_s3, %s415_s28 }
  0x1b   : > { %p417_p12 = pnand %p416_p11, %p520_p5  ;;  %p422_p2 = por %p421_p1, %p420_p0 }
  0x1d   : > { %156 = vperm.xlu1 %391, %v137_v3   ;;  %142 = vperm.xlu0 %390, %v137_v3   ;;  %p418_p13 = pneg %p417_p12 }
  0x1f   : > { %170 = vperm.xlu2 %392, %v137_v3   ;;  %p423_p3 = pnand %p422_p2, %p418_p13 }
  0x25   : > { %393 = vset.pattern.permute.xlu0 %v466_v19 }
  0x26   : > { %235 = vperm.xlu0 %393, %v139_v18  }
  0x71   : > { %v175_v20 = vpop.permute.xlu2 %174 }
  0x79   : > { %v171_v21 = vpop.permute.xlu2 %170 }
  0x87   : > { %v161_v6 = vpop.permute.xlu1 %160  ;;  %v148_v7 = vpop.permute.xlu0 %147 }
  0x88   : > { %v154_v8 = vmul.f32 %v394_v5, %v148_v7 }
  0x8a   : > { %v164_v9 = vadd.f32 %v161_v6, %v154_v8 }
  0x8c   : > { %v166_v10 = vmax.f32 %v164_v9, 0.0 }
  0x8e   : > { %198 = vmatpush.msra.mxu0 %v166_v10  ;;  %345 = vmatpush.msra.mxu2 %v166_v10 }
  0x8f   : > { %v143_v11 = vpop.permute.xlu0 %142  ;;  %v157_v13 = vpop.permute.xlu1 %156 }
  0x90   : > { %v153_v12 = vmul.f32 %v394_v5, %v143_v11 }
  0x92   : > { %v163_v14 = vadd.f32 %v157_v13, %v153_v12 }
  0x94   : > { %v165_v15 = vmax.f32 %v163_v14, 0.0 }
  0x96   : > { %199 = vmatpush.msra.mxu0 %v165_v15  ;;  %346 = vmatpush.msra.mxu2 %v165_v15 }
  0x97   : > { %337 = vmatmul.msk.f32.vlgmr.msra.gmra.mxu0 %vm177_vm0, %v167_v16  ;;  %338 = vmatmul.msk.f32.vlgmr.msra.gmra.mxu2 %vm177_vm0, %v168_v17 }
  0x98   : > { %v236_v29 = vpop.permute.xlu0 %235 }
 0x114   : > { %v201_v22 = vpop.f32.mrf.mxu0 }
 0x115   : > { %v202_v24 = vadd.f32 %v201_v22, %v171_v21 }
 0x117   : > { %v207_v27 = vmax.f32 %v202_v24, 0.0 }
 0x11a   : > { %v204_v23 = vpop.f32.mrf.mxu2 }
 0x11b   : > { %v205_v25 = vadd.f32 %v204_v23, %v175_v20 }
 0x11d   : > { %v208_v26 = vmax.f32 %v205_v25, 0.0 }
 0x11f   : > { %227 = vmatpush.msra.mxu1 %v208_v26 }
 0x121   : > { %228 = vmatpush.msra.mxu1 %v207_v27 }
 0x122   : > { %339 = vmatmul.msk.f32.vlgmr.msra.gmra.mxu1 %vm177_vm0, %v209_v28 }
 0x19f   : > { %v230_v30 = vpop.f32.mrf.mxu1 }
 0x1a0   : > { %v238_v31 = vadd.f32 %v236_v29, %v230_v30 }
 0x1a2   : > { %v340_v32 = vmul.f32 -1.442695, %v238_v31 }
 0x1a4   : > { %395 = vpow2.f32 %v340_v32 }
 0x1aa   : > { %v396_v33 = vpop.eup %395 }
 0x1ab   : > { %v242_v34 = vadd.f32 1.0, %v396_v33 }
 0x1ad   : > { %397 = vrcp.f32 %v242_v34  ;;  %v254_v38 = vand.u32 2147483648, %v242_v34  ;;  %v252_v40 = vand.u32 2147483647, %v242_v34  ;;  %vm248_vm2 = vweird.f32 %v242_v34 }
 0x1af   : > { %v255_v42 = vor.u32 1.1754944e-38, %v254_v38  ;;  %vm253_vm4 = vcmp.eq.f32.partialorder %v252_v40, 8.507059e+37 }
 0x1b3   : > { %v398_v35 = vpop.eup %397 }
 0x1b4   : > { %v244_v36 = vmul.f32 %v398_v35, %v242_v34  ;;  %vm249_vm1 = vweird.f32 %v398_v35 }
 0x1b5   : > { %vm250_vm3 = vmor %vm248_vm2, %vm249_vm1 }
 0x1b6   : > { %v245_v37 = vsub.f32 1.0, %v244_v36 }
 0x1b8   : > { %v246_v39 = vmul.f32 %v398_v35, %v245_v37 }
 0x1ba   : > { %v247_v41 = vadd.f32 %v398_v35, %v246_v39 }
 0x1bc   : > { %v251_v43 = vsel %vm250_vm3, %v398_v35, %v247_v41 }
 0x1bd   : > { %v256_v44 = vsel %vm253_vm4, %v255_v42, %v251_v43 }
 0x1be   : > { %v258_v45 = vmul.f32 100.0, %v256_v44 }
 0x1c0   : > { %259 = vst [vmem:[%s132_s24] sm:$0x3] %v258_v45 }
 0x1c1   : > { %426 = shalt.err (!%p423_p3)
}
 0x1c2   : > { %347 = dma.vmem_to_hbm [thread:$0]  (%p520_p5), %s274_s25, 32, %s276_s26, %s261_s13  }
 0x1c3 PF: > { %p353_p4 = scmp.ge.s32.totalorder %s461_s12, 2  ;;  %s287_s6 = sand.u32 1, %s449_s9  }
 0x1c4   : > { %s288_s7 = scalar_lea.sflag [#allocation3], %s287_s6 }
 0x1c5   : > { %p350_p7 = pnand %p353_p4, %p524_p6 }
 0x1c7   : > { %p351_p8 = pneg %p350_p7 }
 0x1c9   : > { %444 = dma.done.wait (%p351_p8), %s288_s7, 32  }
 0x1ca   : > { %446 = vsyncadd (%p351_p8), %s288_s7, 4294967264  ;;  %p12_p9 = scmp.ge.s32.totalorder %s507_s15, 4   ;;  %s593_s9 = smov %s453_s10 }
 0x1cb   : > { %s594_s10 = smov %s457_s11  ;;  %s595_s11 = smov %s518_s18 }
 0x1cc   : > { %s596_s12 = smov %s507_s15  ;;  %14 = sbr.rel (!%p12_p9) target bundleno = 3 (0x3), region = 63 }
 0x1d1   :  { %294 = vsyncpa [#allocation3], 1 }
 0x1d2   :  { %296 = vsyncpa [#allocation3 + $0x1], 1 }

</bundles_post_ra>
